<compile_context>
chip_gen: v5e
topology: v5e:2x2
jax: 0.10.0
libtpu: 0.0.40
codegen_flags: <defaults>
</compile_context>

<pallas_src>
import jax
import jax.numpy as jnp
from jax.experimental import pallas as pl
from jax.experimental.pallas import tpu as pltpu


def _round_up(x, m):
    return ((x + m - 1) // m) * m


def _mymodel_kernel(scale_ref, x_ref, wbb_ref, bbb_ref, wemb_ref, bemb_ref,
                    wcls_ref, o_ref, acc_ref):
    # scale_ref: (1, 1)  f32  SMEM   logit_scale (runtime scalar, no recompile)
    # x_ref:     (tm, tk)     f32    flattened-image block (cast to bf16 in-kernel)
    # wbb_ref:   (tk, BB)     bf16   backbone weight slab (streamed over k)
    # bbb_ref:   (1, BB)      f32    backbone bias          (single-buffered)
    # wemb_ref:  (BB, Ep)     bf16   embedder weight        (single-buffered)
    # bemb_ref:  (1, Ep)      f32    embedder bias          (single-buffered)
    # wcls_ref:  (Ep, Cp)     bf16   classifier weight      (single-buffered)
    # o_ref:     (tm, Cp)            scores block (lane-dense, padded cols)
    # acc_ref:   (tm, BB)     f32    VMEM accumulator for the backbone matmul
    k = pl.program_id(1)

    @pl.when(k == 0)
    def _():
        acc_ref[...] = jnp.zeros_like(acc_ref)

    # Backbone linear, K-tiled: bf16 operands (cast on the VPU), f32 MXU accum.
    acc_ref[...] += jnp.dot(x_ref[...].astype(jnp.bfloat16), wbb_ref[...],
                            preferred_element_type=jnp.float32)

    @pl.when(k == pl.num_programs(1) - 1)
    def _():
        scale = scale_ref[0, 0]
        h = acc_ref[...] + bbb_ref[...]

        # Embedder linear.
        e = jnp.dot(h.astype(jnp.bfloat16), wemb_ref[...],
                    preferred_element_type=jnp.float32) + bemb_ref[...]

        # F.normalize(e, p=2, dim=1) * logit_scale  (f32 math: v5e has no bf16
        # VPU/EUP). Single fused rsqrt runs on the EUP slot; sq-clamp 1e-24
        # matches F.normalize's 1e-12 norm clamp. Zero-padded embed columns
        # contribute nothing to sq.
        sq = jnp.sum(e * e, axis=1, keepdims=True)
        n = e * (jax.lax.rsqrt(jnp.maximum(sq, 1e-24)) * scale)

        # Classifier (no bias). Kept as a real matmul: the weight trains.
        o_ref[...] = jnp.dot(n.astype(jnp.bfloat16), wcls_ref[...],
                             preferred_element_type=jnp.float32).astype(o_ref.dtype)


def mymodeltrain_forward(x_nchw, params, logit_scale, num_class):
    """params = prepare_params(...) output (bf16 weights, padded)."""
    wbb_bf, bbb, wemb_bf, bemb, wcls_bf = params
    d_pad, bb_dim = wbb_bf.shape
    e_pad = wemb_bf.shape[1]
    c_pad = wcls_bf.shape[1]

    B = x_nchw.shape[0]
    # Keep x f32 end-to-end; the bf16 cast happens in-kernel, so x is read from
    # HBM exactly once (no separate wrapper-side cast pass).
    x_flat = x_nchw.reshape(B, -1)            # row-major, matches torch .view(B, -1)
    if x_flat.dtype != jnp.float32:
        x_flat = x_flat.astype(jnp.float32)
    if x_flat.shape[1] != d_pad:              # zero-pad K to match padded wbb rows
        x_flat = jnp.pad(x_flat, ((0, 0), (0, d_pad - x_flat.shape[1])))

    # Batch tiling: pad to a 16-row multiple (bf16 sublane packing) and pick the
    # largest tile that divides it exactly -> no up-to-(tm-1)-row overcompute.
    b_pad = _round_up(B, 16)
    tm = 16
    for cand in (256, 128, 64, 32, 16):
        if b_pad % cand == 0:
            tm = cand
            break
    if b_pad != B:
        x_flat = jnp.pad(x_flat, ((0, b_pad - B), (0, 0)))

    # K tiling of the backbone reduction: stream wbb as (tk, bb_dim) slabs.
    tk = 128
    for cand in (512, 256, 128):
        if d_pad % cand == 0:
            tk = cand
            break
    n_btiles = b_pad // tm
    n_ktiles = d_pad // tk

    scale = jnp.asarray(logit_scale, jnp.float32).reshape(1, 1)

    # bf16 output when the classifier head is huge (halves HBM writeback).
    out_dtype = jnp.bfloat16 if c_pad >= 2048 else jnp.float32
    out_bytes = jnp.dtype(out_dtype).itemsize

    # Explicit scoped-VMEM budget (default 16/32 MiB is too small at realistic
    # d_in): actual tiles + 50% headroom, floored at the stock 32 MiB.
    vmem_bytes = (
        2 * tm * tk * 4              # x block, double-buffered (f32)
        + 2 * tk * bb_dim * 2        # wbb slab, double-buffered (bf16)
        + bb_dim * 4                 # bbb   (single-buffered)
        + bb_dim * e_pad * 2         # wemb  (single-buffered)
        + e_pad * 4                  # bemb  (single-buffered)
        + e_pad * c_pad * 2          # wcls  (single-buffered)
        + 2 * tm * c_pad * out_bytes  # output, double-buffered
        + tm * bb_dim * 4)           # f32 accumulator scratch
    vmem_limit = max(min(int(vmem_bytes * 1.5) + (2 << 20), 96 << 20), 32 << 20)

    # Megacore: shard the batch axis only when there is enough batch work;
    # otherwise each core would re-DMA every weight slab (doubling wbb HBM
    # traffic in the weight-DMA-bound small-B regime).
    batch_sem = "parallel" if n_btiles >= 4 else "arbitrary"

    flops = 2 * b_pad * (d_pad * bb_dim + bb_dim * e_pad + e_pad * c_pad)
    bytes_accessed = (b_pad * d_pad * 4 + d_pad * bb_dim * 2
                      + bb_dim * e_pad * 2 + e_pad * c_pad * 2
                      + b_pad * c_pad * out_bytes)

    const_block = pl.Buffered(1)   # grid-invariant blocks: no wasted 2nd buffer

    out = pl.pallas_call(
        _mymodel_kernel,
        out_shape=jax.ShapeDtypeStruct((b_pad, c_pad), out_dtype),
        grid=(n_btiles, n_ktiles),                        # reduction axis last
        in_specs=[
            pl.BlockSpec(memory_space=pltpu.SMEM),                      # logit_scale
            pl.BlockSpec((tm, tk), lambda i, k: (i, k)),                # x block
            pl.BlockSpec((tk, bb_dim), lambda i, k: (k, 0)),            # wbb slab
            pl.BlockSpec((1, bb_dim), lambda i, k: (0, 0),
                         pipeline_mode=const_block),                    # bbb
            pl.BlockSpec((bb_dim, e_pad), lambda i, k: (0, 0),
                         pipeline_mode=const_block),                    # wemb
            pl.BlockSpec((1, e_pad), lambda i, k: (0, 0),
                         pipeline_mode=const_block),                    # bemb
            pl.BlockSpec((e_pad, c_pad), lambda i, k: (0, 0),
                         pipeline_mode=const_block),                    # wcls
        ],
        out_specs=pl.BlockSpec((tm, c_pad), lambda i, k: (i, 0)),
        scratch_shapes=[pltpu.VMEM((tm, bb_dim), jnp.float32)],
        compiler_params=pltpu.CompilerParams(
            dimension_semantics=(batch_sem, "arbitrary"),
            vmem_limit_bytes=vmem_limit),
        cost_estimate=pl.CostEstimate(flops=flops, transcendentals=b_pad,
                                      bytes_accessed=bytes_accessed),
    )(scale, x_flat, wbb_bf, bbb, wemb_bf, bemb, wcls_bf)

    return out[:B, :num_class].astype(jnp.float32)


def init_params_f32(key, d_in, bb_dim, embed_dim, num_class):
    k1, k2, k3, k4 = jax.random.split(key, 4)
    # Backbone linear (flatten + Linear); stored transposed as (d_in, bb_dim).
    wbb_t = jax.random.normal(k1, (d_in, bb_dim), jnp.float32) * (1.0 / jnp.sqrt(d_in))
    bbb = jax.random.normal(k2, (1, bb_dim), jnp.float32) * 0.01
    # Embedder Linear(bb_dim -> embed_dim)
    wemb_t = jax.random.normal(k3, (bb_dim, embed_dim), jnp.float32) * (1.0 / jnp.sqrt(bb_dim))
    bemb = jax.random.normal(k4, (1, embed_dim), jnp.float32) * 0.01
    # Classifier Linear(embed_dim -> num_class, bias=False):
    #   weight.fill_(1.0) then F.normalize(weight, p=2, dim=0) -> 1/sqrt(num_class)
    wcls = jnp.ones((num_class, embed_dim), jnp.float32)
    wcls = wcls / jnp.sqrt(jnp.sum(wcls * wcls, axis=0, keepdims=True))
    wcls_t = wcls.T  # (embed_dim, num_class)
    return wbb_t, bbb, wemb_t, bemb, wcls_t


def prepare_params(params_f32, num_class):
    """One-time prep: cast matmul weights to bf16, pad dims for MXU/lane fill.

    - d_in padded to a multiple of 128 (K tiling)            -> extra wbb rows = 0
    - embed_dim padded to a multiple of 256 (fills 256x MXU)  -> extra cols/rows = 0
    - num_class padded to a multiple of 128 (lane-dense store)
    All padding is with zeros, so results are mathematically identical.
    """
    wbb_t, bbb, wemb_t, bemb, wcls_t = params_f32
    d_in, bb_dim = wbb_t.shape
    embed_dim = wemb_t.shape[1]

    d_pad = _round_up(d_in, 128)
    e_pad = _round_up(embed_dim, 256)
    c_pad = _round_up(num_class, 128)

    wbb_p = jnp.pad(wbb_t, ((0, d_pad - d_in), (0, 0)))
    wemb_p = jnp.pad(wemb_t, ((0, 0), (0, e_pad - embed_dim)))
    bemb_p = jnp.pad(bemb, ((0, 0), (0, e_pad - embed_dim)))
    wcls_p = jnp.pad(wcls_t, ((0, e_pad - embed_dim), (0, c_pad - num_class)))

    return (wbb_p.astype(jnp.bfloat16),
            bbb.astype(jnp.float32),
            wemb_p.astype(jnp.bfloat16),
            bemb_p.astype(jnp.float32),
            wcls_p.astype(jnp.bfloat16))


def reference_forward(x_nchw, kernel_params, logit_scale, num_class):
    """Pure-JAX reference sharing the kernel's bf16 operand quantization."""
    wbb, bbb, wemb, bemb, wcls = kernel_params
    B = x_nchw.shape[0]
    x = x_nchw.reshape(B, -1).astype(jnp.float32)
    d_pad = wbb.shape[0]
    if x.shape[1] != d_pad:
        x = jnp.pad(x, ((0, 0), (0, d_pad - x.shape[1])))
    xq = x.astype(jnp.bfloat16).astype(jnp.float32)
    h = xq @ wbb.astype(jnp.float32) + bbb
    hq = h.astype(jnp.bfloat16).astype(jnp.float32)
    e = hq @ wemb.astype(jnp.float32) + bemb
    n = e / jnp.maximum(jnp.linalg.norm(e, axis=1, keepdims=True), 1e-12) * logit_scale
    nq = n.astype(jnp.bfloat16).astype(jnp.float32)
    return (nq @ wcls.astype(jnp.float32))[:, :num_class]


if __name__ == "__main__":
    # Small shapes consistent with the module's forward.
    B, C, H, W = 2, 4, 16, 16
    d_in = C * H * W            # 1024
    bb_dim = 256                # backbone feature dim
    embed_dim = 128             # MyModel.final_feat_dim (small for the test)
    num_class = 64
    logit_scale = 64.0

    key = jax.random.PRNGKey(0)
    kx, kp = jax.random.split(key)
    x = jax.random.normal(kx, (B, C, H, W), jnp.float32)

    params_f32 = init_params_f32(kp, d_in, bb_dim, embed_dim, num_class)
    params = prepare_params(params_f32, num_class)

    scores = mymodeltrain_forward(x, params, logit_scale, num_class)
    scores = jax.block_until_ready(scores)

    # Sanity check against pure-JAX reference (tolerance relaxed for bf16
    # matmul operands; accumulation stays f32).
    ref = reference_forward(x, params, logit_scale, num_class)
    assert scores.shape == (B, num_class)
    assert jnp.allclose(scores, ref, atol=2e-1, rtol=2e-2), \
        float(jnp.max(jnp.abs(scores - ref)))

    print("KERNEL_OK")
</pallas_src>

<mosaic_0001>
module attributes {stable_mosaic.version = 11 : i64} {
  func.func @_mymodel_kernel(%arg0: i32, %arg1: i32, %arg2: memref<1x1xf32, #tpu.memory_space<smem>>, %arg3: memref<16x512xf32, #tpu.memory_space<vmem>>, %arg4: memref<512x256xbf16, #tpu.memory_space<vmem>>, %arg5: memref<1x256xf32, #tpu.memory_space<vmem>>, %arg6: memref<256x256xbf16, #tpu.memory_space<vmem>>, %arg7: memref<1x256xf32, #tpu.memory_space<vmem>>, %arg8: memref<256x128xbf16, #tpu.memory_space<vmem>>, %arg9: memref<16x128xf32, #tpu.memory_space<vmem>>, %arg10: memref<16x256xf32, #tpu.memory_space<vmem>>) attributes {dimension_semantics = [#tpu.dimension_semantics<arbitrary>, #tpu.dimension_semantics<arbitrary>], iteration_bounds = array<i64: 1, 2>, scalar_prefetch = 0 : i64, scratch_operands = 1 : i64, tpu.core_type = #tpu.core_type<tc>, window_params = [{transform_indices = @transform_0, window_bounds = array<i64: 1, 1>}, {transform_indices = @transform_1, window_bounds = array<i64: 16, 512>}, {transform_indices = @transform_2, window_bounds = array<i64: 512, 256>}, {pipeline_mode = #tpu.pipeline_mode<synchronous>, transform_indices = @transform_3, window_bounds = array<i64: 1, 256>}, {pipeline_mode = #tpu.pipeline_mode<synchronous>, transform_indices = @transform_4, window_bounds = array<i64: 256, 256>}, {pipeline_mode = #tpu.pipeline_mode<synchronous>, transform_indices = @transform_5, window_bounds = array<i64: 1, 256>}, {pipeline_mode = #tpu.pipeline_mode<synchronous>, transform_indices = @transform_6, window_bounds = array<i64: 256, 128>}, {transform_indices = @transform_7, window_bounds = array<i64: 16, 128>}]} {
    %c0_i32 = arith.constant 0 : i32
    %0 = arith.cmpi eq, %arg1, %c0_i32 : i32
    %1 = arith.extui %0 : i1 to i32
    %c0_i32_0 = arith.constant 0 : i32
    %2 = arith.cmpi ne, %1, %c0_i32_0 : i32
    scf.if %2 {
      %cst_9 = arith.constant 0.000000e+00 : f32
      %13 = vector.broadcast %cst_9 : f32 to vector<16x256xf32>
      %c0_10 = arith.constant 0 : index
      %c0_11 = arith.constant 0 : index
      %14 = vector.load %arg10[%c0_10, %c0_11] : memref<16x256xf32, #tpu.memory_space<vmem>>, vector<16x256xf32>
      tpu.vector_store %arg10[%c0_10, %c0_11], %13 {strides = array<i32>} : memref<16x256xf32, #tpu.memory_space<vmem>>, vector<16x256xf32>,
    } else {
    }
    %c0 = arith.constant 0 : index
    %c0_1 = arith.constant 0 : index
    %3 = vector.load %arg10[%c0, %c0_1] : memref<16x256xf32, #tpu.memory_space<vmem>>, vector<16x256xf32>
    %c0_2 = arith.constant 0 : index
    %c0_3 = arith.constant 0 : index
    %4 = vector.load %arg3[%c0_2, %c0_3] : memref<16x512xf32, #tpu.memory_space<vmem>>, vector<16x512xf32>
    %5 = arith.truncf %4 : vector<16x512xf32> to vector<16x512xbf16>
    %c0_4 = arith.constant 0 : index
    %c0_5 = arith.constant 0 : index
    %6 = vector.load %arg4[%c0_4, %c0_5] : memref<512x256xbf16, #tpu.memory_space<vmem>>, vector<512x256xbf16>
    %cst = arith.constant dense<0.000000e+00> : vector<16x256xf32>
    %7 = tpu.matmul %5, %6, %cst {dimension_numbers = #tpu.dot_dimension_numbers<[1], [0], [0], [1], [0, 0, 1, 1], [], []>} : vector<16x512xbf16>, vector<512x256xbf16>, vector<16x256xf32> -> vector<16x256xf32>
    %8 = arith.addf %3, %7 : vector<16x256xf32>
    %c0_6 = arith.constant 0 : index
    %c0_7 = arith.constant 0 : index
    %9 = vector.load %arg10[%c0_6, %c0_7] : memref<16x256xf32, #tpu.memory_space<vmem>>, vector<16x256xf32>
    tpu.vector_store %arg10[%c0_6, %c0_7], %8 {strides = array<i32>} : memref<16x256xf32, #tpu.memory_space<vmem>>, vector<16x256xf32>,
    %c1_i32 = arith.constant 1 : i32
    %10 = arith.cmpi eq, %arg1, %c1_i32 : i32
    %11 = arith.extui %10 : i1 to i32
    %c0_i32_8 = arith.constant 0 : i32
    %12 = arith.cmpi ne, %11, %c0_i32_8 : i32
    scf.if %12 {
      %c0_9 = arith.constant 0 : index
      %c0_10 = arith.constant 0 : index
      %13 = memref.load %arg2[%c0_9, %c0_10] : memref<1x1xf32, #tpu.memory_space<smem>>
      %c0_11 = arith.constant 0 : index
      %c0_12 = arith.constant 0 : index
      %14 = vector.load %arg10[%c0_11, %c0_12] : memref<16x256xf32, #tpu.memory_space<vmem>>, vector<16x256xf32>
      %c0_13 = arith.constant 0 : index
      %c0_14 = arith.constant 0 : index
      %15 = vector.load %arg5[%c0_13, %c0_14] : memref<1x256xf32, #tpu.memory_space<vmem>>, vector<1x256xf32>
      %16 = vector.broadcast %15 : vector<1x256xf32> to vector<16x256xf32>
      %17 = arith.addf %14, %16 : vector<16x256xf32>
      %18 = arith.truncf %17 : vector<16x256xf32> to vector<16x256xbf16>
      %c0_15 = arith.constant 0 : index
      %c0_16 = arith.constant 0 : index
      %19 = vector.load %arg6[%c0_15, %c0_16] : memref<256x256xbf16, #tpu.memory_space<vmem>>, vector<256x256xbf16>
      %cst_17 = arith.constant dense<0.000000e+00> : vector<16x256xf32>
      %20 = tpu.matmul %18, %19, %cst_17 {dimension_numbers = #tpu.dot_dimension_numbers<[1], [0], [0], [1], [0, 0, 1, 1], [], []>} : vector<16x256xbf16>, vector<256x256xbf16>, vector<16x256xf32> -> vector<16x256xf32>
      %c0_18 = arith.constant 0 : index
      %c0_19 = arith.constant 0 : index
      %21 = vector.load %arg7[%c0_18, %c0_19] : memref<1x256xf32, #tpu.memory_space<vmem>>, vector<1x256xf32>
      %22 = vector.broadcast %21 : vector<1x256xf32> to vector<16x256xf32>
      %23 = arith.addf %20, %22 : vector<16x256xf32>
      %24 = arith.mulf %23, %23 : vector<16x256xf32>
      %cst_20 = arith.constant dense<0.000000e+00> : vector<16xf32>
      %25 = vector.multi_reduction <add>, %24, %cst_20 [1] : vector<16x256xf32> to vector<16xf32>
      %26 = vector.shape_cast %25 : vector<16xf32> to vector<16x1xf32>
      %cst_21 = arith.constant 1.000000e-24 : f32
      %27 = vector.broadcast %cst_21 : f32 to vector<16x1xf32>
      %28 = arith.maximumf %26, %27 : vector<16x1xf32>
      %29 = math.rsqrt %28 : vector<16x1xf32>
      %30 = vector.broadcast %13 : f32 to vector<16x1xf32>
      %31 = arith.mulf %29, %30 : vector<16x1xf32>
      %32 = vector.broadcast %31 : vector<16x1xf32> to vector<16x256xf32>
      %33 = arith.mulf %23, %32 : vector<16x256xf32>
      %34 = arith.truncf %33 : vector<16x256xf32> to vector<16x256xbf16>
      %c0_22 = arith.constant 0 : index
      %c0_23 = arith.constant 0 : index
      %35 = vector.load %arg8[%c0_22, %c0_23] : memref<256x128xbf16, #tpu.memory_space<vmem>>, vector<256x128xbf16>
      %cst_24 = arith.constant dense<0.000000e+00> : vector<16x128xf32>
      %36 = tpu.matmul %34, %35, %cst_24 {dimension_numbers = #tpu.dot_dimension_numbers<[1], [0], [0], [1], [0, 0, 1, 1], [], []>} : vector<16x256xbf16>, vector<256x128xbf16>, vector<16x128xf32> -> vector<16x128xf32>
      %c0_25 = arith.constant 0 : index
      %c0_26 = arith.constant 0 : index
      %37 = vector.load %arg9[%c0_25, %c0_26] : memref<16x128xf32, #tpu.memory_space<vmem>>, vector<16x128xf32>
      tpu.vector_store %arg9[%c0_25, %c0_26], %36 {strides = array<i32>} : memref<16x128xf32, #tpu.memory_space<vmem>>, vector<16x128xf32>,
    } else {
    }
    return
  }
  func.func @transform_0(%arg0: i32, %arg1: i32) -> (i32, i32) {
    %c0_i32 = arith.constant 0 : i32
    %c0_i32_0 = arith.constant 0 : i32
    %c0_i32_1 = arith.constant 0 : i32
    return %c0_i32, %c0_i32_0 : i32, i32
  }
  func.func @transform_1(%arg0: i32, %arg1: i32) -> (i32, i32) {
    %c0_i32 = arith.constant 0 : i32
    return %arg0, %arg1 : i32, i32
  }
  func.func @transform_2(%arg0: i32, %arg1: i32) -> (i32, i32) {
    %c0_i32 = arith.constant 0 : i32
    %c0_i32_0 = arith.constant 0 : i32
    return %arg1, %c0_i32 : i32, i32
  }
  func.func @transform_3(%arg0: i32, %arg1: i32) -> (i32, i32) {
    %c0_i32 = arith.constant 0 : i32
    %c0_i32_0 = arith.constant 0 : i32
    %c0_i32_1 = arith.constant 0 : i32
    return %c0_i32, %c0_i32_0 : i32, i32
  }
  func.func @transform_4(%arg0: i32, %arg1: i32) -> (i32, i32) {
    %c0_i32 = arith.constant 0 : i32
    %c0_i32_0 = arith.constant 0 : i32
    %c0_i32_1 = arith.constant 0 : i32
    return %c0_i32, %c0_i32_0 : i32, i32
  }
  func.func @transform_5(%arg0: i32, %arg1: i32) -> (i32, i32) {
    %c0_i32 = arith.constant 0 : i32
    %c0_i32_0 = arith.constant 0 : i32
    %c0_i32_1 = arith.constant 0 : i32
    return %c0_i32, %c0_i32_0 : i32, i32
  }
  func.func @transform_6(%arg0: i32, %arg1: i32) -> (i32, i32) {
    %c0_i32 = arith.constant 0 : i32
    %c0_i32_0 = arith.constant 0 : i32
    %c0_i32_1 = arith.constant 0 : i32
    return %c0_i32, %c0_i32_0 : i32, i32
  }
  func.func @transform_7(%arg0: i32, %arg1: i32) -> (i32, i32) {
    %c0_i32 = arith.constant 0 : i32
    %c0_i32_0 = arith.constant 0 : i32
    return %arg0, %c0_i32 : i32, i32
  }
}

</mosaic_0001>

<bundles_post_ra>
// kernel: tpu_custom_call.1
= control target key start
LH: loop header
LB: loop body
LE: loop exit
PB: predicated region body
PF: predicated region fallthrough
CT: control target
= control target key end

     0   :  { %s2798_s0 = inlined_call_operand.<no memory space> [shape: f32[1,1], index: 0, kind: input, shape index: {}]   ;;  %s2799_s1 = inlined_call_operand.hbm [shape: f32[16,1024], index: 1, kind: input, shape index: {}]   ;;  %s2800_s2 = inlined_call_operand.hbm [shape: bf16[1024,256], index: 2, kind: input, shape index: {}]   ;;  %s2801_s3 = inlined_call_operand.vmem [shape: f32[1,256], index: 3, kind: input, shape index: {}]   ;;  %s2802_s4 = inlined_call_operand.hbm [shape: bf16[256,256], index: 4, kind: input, shape index: {}]   ;;  %s2803_s5 = inlined_call_operand.vmem [shape: f32[1,256], index: 5, kind: input, shape index: {}]   ;;  %s2804_s6 = inlined_call_operand.hbm [shape: bf16[256,128], index: 6, kind: input, shape index: {}]   ;;  %s2805_s7 = inlined_call_operand.hbm [shape: f32[16,128], index: 7, kind: output, shape index: {}]  }
   0x1   :  { %2810 = sst [smem:[#allocation21_spill]] %s2799_s1 }
   0x2   :  { %2811 = sst [smem:[#allocation22_spill]] %s2802_s4 }
   0x3   :  { %2812 = sst [smem:[#allocation23_spill]] %s2804_s6 }
   0x4   :  { %12 = sst [smem:[#allocation3]] %s2798_s0 }
   0x5   :  { %13 = vsyncpa [#allocation5], 0 }
   0x6   :  { %15 = vsyncpa [#allocation5 + $0x1], 0 }
   0x7   :  { %16 = vsyncpa [#allocation8], 0 }
   0x8   :  { %18 = vsyncpa [#allocation8 + $0x1], 0 }
   0x9   :  { %19 = vsyncpa [#allocation11], 0 }
   0xa   :  { %20 = vsyncpa [#allocation6], 0  ;;  %s2472_s26 = smov 0   ;;  %s2474_s27 = smov 0  }
   0xb   :  { %s2476_s28 = smov 0   ;;  %s2478_s29 = smov 0  }
   0xc   :  { %s2480_s30 = smov 0   ;;  %s2482_s8 = smov 0  }
   0xd LB: > { %2813 = sst [smem:[#allocation18_spill]] %s2402_s28  ;;  %s2501_s0 = sadd.s32 4294967295, %s2414_s8   ;;  %s2414_s8 = sphi %s2482_s8, %s26_s8   ;;  %s2410_s30 = sphi %s2480_s30, %s2831_s30   ;;  %s2406_s29 = sphi %s2478_s29, %s2830_s29   ;;  %s2402_s28 = sphi %s2476_s28, %s2826_s28   ;;  %s2398_s27 = sphi %s2474_s27, %s2829_s27   ;;  %s2394_s26 = sphi %s2472_s26, %s2828_s26  }
   0xe   : > { %p81_p0 = scmp.ne.s32.totalorder %s2398_s27, %s2394_s26  ;;  %p82_p1 = scmp.eq.s32.totalorder %s2501_s0, 0 }
   0xf   : > { %p1513_p2 = scmp.ge.s32.totalorder %s2414_s8, 1  ;;  %p228_p3 = scmp.lt.s32.totalorder %s2414_s8, 3 }
  0x10   : > { %p2509_p4 = por %p82_p1, %p81_p0  ;;  %s2815_s4 = sld [smem:[#allocation22_spill]] }
  0x11   : > { %p2516_p5 = pnand %p1513_p2, %p228_p3  ;;  %s2416_s14 = smov [#allocation9]  }
  0x12   : > { %s247_s15 = sshll.u32 %s2416_s14, 4  ;;  %s2817_s6 = sld [smem:[#allocation23_spill]]  ;;  %s248_s15 = int_to_ptr.vmem [resolvable:$true] %s247_s15 }
  0x13   : > { %p2114_p6 = pneg %p2516_p5  ;;  %s2806_s19 = smov 128  }
  0x14   : > { %s2807_s20 = smov 8   ;;  %s2419_s21 = smov [#allocation10]  }
  0x15   : > { %p2115_p7 = pnand %p2114_p6, %p82_p1  ;;  %s264_s22 = sshll.u32 %s2419_s21, 4  ;;  %s265_s22 = int_to_ptr.vmem [resolvable:$true] %s264_s22 }
  0x16   : > { %s245_s12 = sshll.u32 %s2815_s4, 4  ;;  %s2420_s23 = smov 64   ;;  %s246_s12 = int_to_ptr.hbm [resolvable:$true] %s245_s12 }
  0x17   : > { %2117 = dma.hbm_to_vmem [thread:$0]  (!%p2115_p7), %s246_s12, 4096, %s248_s15, [#allocation8], %s2806_s19, %s2806_s19, %s2807_s20  }
  0x18   : > { %s262_s18 = sshll.u32 %s2817_s6, 4  ;;  %s2421_s24 = smov 4   ;;  %s263_s18 = int_to_ptr.hbm [resolvable:$true] %s262_s18 }
  0x19   : > { %2120 = dma.hbm_to_vmem [thread:$0]  (!%p2115_p7), %s263_s18, 2048, %s265_s22, [#allocation11], %s2420_s23, %s2420_s23, %s2421_s24  }
  0x1a   : > { %s35_s25 = sadd.s32 1, %s2410_s30  ;;  %s68_s26 = sadd.s32 1, %s2402_s28 }
  0x1b   : > { %p36_p8 = scmp.ge.s32.totalorder %s35_s25, 2  ;;  %p75_p9 = scmp.ne.s32.totalorder %s2402_s28, %s2398_s27 }
  0x1c   : > { %p76_p10 = scmp.eq.s32.totalorder %s2414_s8, 0  ;;  %p2130_p11 = scmp.lt.s32.totalorder %s2414_s8, 2 }
  0x1d   : > { %s2833_s25 = smov (%p36_p8, %s35_s25), 0  ;;  %s278_s11 = sand.u32 1, %s2402_s28  }
  0x1e   : > { %2818 = sst [smem:[#allocation19_spill]] %s2833_s25  ;;  %p2538_p12 = por %p76_p10, %p75_p9 }
  0x1f   : > { %s64_s12 = ssub.s32 %s2410_s30, %s2833_s25  ;;  %s1517_s14 = sshll.u32 %s278_s11, 6 }
  0x20   : > { %p66_p13 = scmp.eq.s32.totalorder %s64_s12, 0  ;;  %s1983_s15 = sshll.u32 %s2410_s30, 5 }
  0x21   : > { %s2821_s1 = sld [smem:[#allocation21_spill]]  ;;  %s282_s22 = scalar_lea.vmem [#allocation4], %s1517_s14 }
  0x22   : > { %s2547_s16 = scalar_select %p66_p13, %s2402_s28, %s68_s26  }
  0x23   : > { %s293_s23 = sshll.u32 %s282_s22, 4  ;;  %p2556_p0 = pnand %p2130_p11, %p2538_p12  ;;  %s294_s23 = int_to_ptr.vmem [resolvable:$true] %s293_s23 }
  0x24   : > { %2820 = sst [smem:[#allocation20_spill]] %s2547_s16  ;;  %s279_s12 = scalar_lea.sflag [#allocation5], %s278_s11 }
  0x25   : > { %s2422_s26 = smov 1024   ;;  %s2423_s20 = smov 512  }
  0x26   : > { %s2424_s4 = smov 32   ;;  %s1520_s14 = sshll.u32 %s278_s11, 9 }
  0x27   : > { %s290_s21 = scalar_lea.hbm %s2821_s1, %s1983_s15  ;;  %s303_s15 = sand.u32 1, %s2414_s8  }
  0x28   : > { %s291_s24 = sshll.u32 %s290_s21, 4  ;;  %s1985_s17 = sshll.u32 %s2410_s30, 9  ;;  %s292_s24 = int_to_ptr.hbm [resolvable:$true] %s291_s24 }
  0x29   : > { %2124 = dma.hbm_to_vmem [thread:$0]  (!%p2556_p0), %s292_s24, 1024, %s294_s23, %s279_s12, %s2422_s26, %s2423_s20, %s2424_s4  }
  0x2a   : > { %s307_s18 = scalar_lea.vmem [#allocation7], %s1520_s14  ;;  %s313_s1 = scalar_lea.hbm %s2800_s2, %s1985_s17 }
  0x2b   : > { %s316_s21 = sshll.u32 %s307_s18, 4  ;;  %s314_s6 = sshll.u32 %s313_s1, 4  ;;  %s317_s21 = int_to_ptr.vmem [resolvable:$true] %s316_s21  ;;  %s315_s6 = int_to_ptr.hbm [resolvable:$true] %s314_s6 }
  0x2c   : > { %s304_s25 = scalar_lea.sflag [#allocation8], %s303_s15  ;;  %s2823_s16 = smov 8  }
  0x2d   : > { %s2824_s28 = smov 128   ;;  %328 = sbr.rel (%p2516_p5) target bundleno = 753 (0x2f1), region = 48 }
  0x2e   : > { %2127 = dma.hbm_to_vmem [thread:$0]  (!%p2556_p0), %s315_s6, 8192, %s317_s21, %s304_s25, %s2824_s28, %s2824_s28, %s2823_s16  }
  0x2f   : > { %s330_s4 = sand.u32 (!%p2516_p5), 1, %s2398_s27  }
  0x30   : > { %s1525_s20 = sshll.u32 (!%p2516_p5), %s330_s4, 6  ;;  %s331_s11 = scalar_lea.sflag (!%p2516_p5), [#allocation5], %s330_s4 }
  0x31   : > { %s2575_s23 = scalar_lea.vmem (!%p2516_p5), [#allocation4], %s1525_s20 }
  0x32   : > { %2373 = dma.done.wait (%p2509_p4), %s331_s11, 1024  }
  0x33   : > { %2375 = vsyncadd (%p2509_p4), %s331_s11, 4294966272  ;;  %s340_s1 = sand.u32 1, %s2501_s0   ;;  %s1526_s19 = sshll.u32 %s330_s4, 9 }
  0x34   : > { %s341_s6 = scalar_lea.sflag [#allocation8], %s340_s1  ;;  %s2582_s28 = scalar_lea.vmem [#allocation7], %s1526_s19 }
  0x35   : > { %2377 = dma.done.wait (%p2509_p4), %s341_s6, 8192  }
  0x36   : > { %2379 = vsyncadd (%p2509_p4), %s341_s6, 4294959104 }
  0x37   : > { %2381 = dma.done.wait (%p82_p1), [#allocation8], 4096  }
  0x38   : > { %2383 = vsyncadd (%p82_p1), [#allocation8], 4294963200 }
  0x39   : > { %2385 = dma.done.wait (%p82_p1), [#allocation11], 2048  }
  0x3a   : > { %2387 = vsyncadd (%p82_p1), [#allocation11], 4294965248  ;;  %p1529_p2 = scmp.ne.s32.totalorder %s2406_s29, 0 }
  0x3c   : > { %393 = sbr.rel (%p1529_p2) target bundleno = 70 (0x46), region = 68 }
  0x41   : > { %v2425_v0 = vmov 0.0  }
  0x42   : > { %394 = vst [vmem:[#allocation2 + $0x10] sm:$0xff] %v2425_v0 }
  0x43   : > { %395 = vst [vmem:[#allocation2] sm:$0xff] %v2425_v0 }
  0x44   : > { %396 = vst [vmem:[#allocation2 + $0x18] sm:$0xff] %v2425_v0 }
  0x45   : > { %397 = vst [vmem:[#allocation2 + $0x8] sm:$0xff] %v2425_v0 }
  0x46 PF: > { %v1588_v1 = vld [vmem:[%s2582_s28 + $0x70] sm:$0xf]  ;;  %v2001_v2 = vld [vmem:[%s2582_s28 + $0x74] sm:$0xf0]  ;;  %v1580_v12 = vld [vmem:[%s2582_s28 + $0x60] sm:$0xf] }
  0x47   : > { %v1652_v3 = vld [vmem:[%s2582_s28 + $0xf0] sm:$0xf]  ;;  %v1589_v4 = vor.u32 %v2001_v2, %v1588_v1  ;;  %v2017_v5 = vld [vmem:[%s2582_s28 + $0xf4] sm:$0xf0]  ;;  %v1999_v14 = vld [vmem:[%s2582_s28 + $0x64] sm:$0xf0] }
  0x48   : > { %v1716_v6 = vld [vmem:[%s2582_s28 + $0x170] sm:$0xf]  ;;  %v2033_v7 = vld [vmem:[%s2582_s28 + $0x174] sm:$0xf0]  ;;  %v1653_v8 = vor.u32 %v2017_v5, %v1652_v3  ;;  %v1644_v15 = vld [vmem:[%s2582_s28 + $0xe0] sm:$0xf]  ;;  %v1581_v17 = vor.u32 %v1999_v14, %v1580_v12 }
  0x49   : > { %v1717_v9 = vor.u32 %v2033_v7, %v1716_v6  ;;  %v1780_v10 = vld [vmem:[%s2582_s28 + $0x1f0] sm:$0xf]  ;;  %v2049_v11 = vld [vmem:[%s2582_s28 + $0x1f4] sm:$0xf0]  ;;  %798 = vmatpush.bf16.msra.mxu0 %v1589_v4  ;;  %v2015_v16 = vld [vmem:[%s2582_s28 + $0xe4] sm:$0xf0] }
  0x4a   : > { %v1781_v13 = vor.u32 %v2049_v11, %v1780_v10  ;;  %812 = vmatpush.bf16.msra.mxu1 %v1653_v8  ;;  %v1645_v18 = vor.u32 %v2015_v16, %v1644_v15  ;;  %v1708_v19 = vld [vmem:[%s2582_s28 + $0x160] sm:$0xf]  ;;  %v2031_v20 = vld [vmem:[%s2582_s28 + $0x164] sm:$0xf0]  ;;  %v1572_v24 = vld [vmem:[%s2582_s28 + $0x50] sm:$0xf] }
  0x4b   : > { %826 = vmatpush.bf16.msra.mxu2 %v1717_v9  ;;  %v1772_v21 = vld [vmem:[%s2582_s28 + $0x1e0] sm:$0xf]  ;;  %v1709_v22 = vor.u32 %v2031_v20, %v1708_v19  ;;  %v2047_v23 = vld [vmem:[%s2582_s28 + $0x1e4] sm:$0xf0]  ;;  %v1997_v25 = vld [vmem:[%s2582_s28 + $0x54] sm:$0xf0] }
  0x4c   : > { %840 = vmatpush.bf16.msra.mxu3 %v1781_v13  ;;  %v1773_v26 = vor.u32 %v2047_v23, %v1772_v21  ;;  %v1636_v27 = vld [vmem:[%s2582_s28 + $0xd0] sm:$0xf]  ;;  %v2013_v28 = vld [vmem:[%s2582_s28 + $0xd4] sm:$0xf0]  ;;  %v1573_v30 = vor.u32 %v1997_v25, %v1572_v24  ;;  %v1564_v36 = vld [vmem:[%s2582_s28 + $0x40] sm:$0xf] }
  0x4d   : > { %v1700_v29 = vld [vmem:[%s2582_s28 + $0x150] sm:$0xf]  ;;  %799 = vmatpush.bf16.msra.mxu0 %v1581_v17  ;;  %v2029_v31 = vld [vmem:[%s2582_s28 + $0x154] sm:$0xf0]  ;;  %v1637_v34 = vor.u32 %v2013_v28, %v1636_v27  ;;  %v1995_v37 = vld [vmem:[%s2582_s28 + $0x44] sm:$0xf0] }
  0x4e   : > { %v1764_v32 = vld [vmem:[%s2582_s28 + $0x1d0] sm:$0xf]  ;;  %v2045_v33 = vld [vmem:[%s2582_s28 + $0x1d4] sm:$0xf0]  ;;  %813 = vmatpush.bf16.msra.mxu1 %v1645_v18  ;;  %v1701_v35 = vor.u32 %v2029_v31, %v1700_v29  ;;  %v1628_v38 = vld [vmem:[%s2582_s28 + $0xc0] sm:$0xf]  ;;  %v1565_v45 = vor.u32 %v1995_v37, %v1564_v36 }
  0x4f   : > { %827 = vmatpush.bf16.msra.mxu2 %v1709_v22  ;;  %v1765_v39 = vor.u32 %v2045_v33, %v1764_v32  ;;  %v2011_v40 = vld [vmem:[%s2582_s28 + $0xc4] sm:$0xf0]  ;;  %v1692_v41 = vld [vmem:[%s2582_s28 + $0x140] sm:$0xf]  ;;  %v1556_v48 = vld [vmem:[%s2582_s28 + $0x30] sm:$0xf] }
  0x50   : > { %841 = vmatpush.bf16.msra.mxu3 %v1773_v26  ;;  %v2027_v42 = vld [vmem:[%s2582_s28 + $0x144] sm:$0xf0]  ;;  %v1756_v43 = vld [vmem:[%s2582_s28 + $0x1c0] sm:$0xf]  ;;  %v1629_v46 = vor.u32 %v2011_v40, %v1628_v38  ;;  %v1993_v49 = vld [vmem:[%s2582_s28 + $0x34] sm:$0xf0] }
  0x51   : > { %v2043_v44 = vld [vmem:[%s2582_s28 + $0x1c4] sm:$0xf0]  ;;  %800 = vmatpush.bf16.msra.mxu0 %v1573_v30  ;;  %v1693_v47 = vor.u32 %v2027_v42, %v1692_v41  ;;  %v1620_v50 = vld [vmem:[%s2582_s28 + $0xb0] sm:$0xf]  ;;  %v2009_v52 = vld [vmem:[%s2582_s28 + $0xb4] sm:$0xf0]  ;;  %v1557_v57 = vor.u32 %v1993_v49, %v1556_v48 }
  0x52   : > { %814 = vmatpush.bf16.msra.mxu1 %v1637_v34  ;;  %v1757_v51 = vor.u32 %v2043_v44, %v1756_v43  ;;  %v1684_v53 = vld [vmem:[%s2582_s28 + $0x130] sm:$0xf]  ;;  %v2025_v54 = vld [vmem:[%s2582_s28 + $0x134] sm:$0xf0]  ;;  %v1621_v58 = vor.u32 %v2009_v52, %v1620_v50  ;;  %v1548_v60 = vld [vmem:[%s2582_s28 + $0x20] sm:$0xf] }
  0x53   : > { %828 = vmatpush.bf16.msra.mxu2 %v1701_v35  ;;  %v1748_v55 = vld [vmem:[%s2582_s28 + $0x1b0] sm:$0xf]  ;;  %v2041_v56 = vld [vmem:[%s2582_s28 + $0x1b4] sm:$0xf0]  ;;  %v1685_v59 = vor.u32 %v2025_v54, %v1684_v53  ;;  %v1991_v61 = vld [vmem:[%s2582_s28 + $0x24] sm:$0xf0] }
  0x54   : > { %842 = vmatpush.bf16.msra.mxu3 %v1765_v39  ;;  %v1612_v62 = vld [vmem:[%s2582_s28 + $0xa0] sm:$0xf]  ;;  %v1749_v63 = vor.u32 %v2041_v56, %v1748_v55  ;;  %v2007_v0 = vld [vmem:[%s2582_s28 + $0xa4] sm:$0xf0]  ;;  %v1549_v5 = vor.u32 %v1991_v61, %v1548_v60  ;;  %v1540_v8 = vld [vmem:[%s2582_s28 + $0x10] sm:$0xf] }
  0x55   : > { %801 = vmatpush.bf16.msra.mxu0 %v1565_v45  ;;  %v1676_v1 = vld [vmem:[%s2582_s28 + $0x120] sm:$0xf]  ;;  %v2023_v2 = vld [vmem:[%s2582_s28 + $0x124] sm:$0xf0]  ;;  %v1613_v6 = vor.u32 %v2007_v0, %v1612_v62  ;;  %v1989_v9 = vld [vmem:[%s2582_s28 + $0x14] sm:$0xf0] }
  0x56   : > { %815 = vmatpush.bf16.msra.mxu1 %v1629_v46  ;;  %v1740_v3 = vld [vmem:[%s2582_s28 + $0x1a0] sm:$0xf]  ;;  %v2039_v4 = vld [vmem:[%s2582_s28 + $0x1a4] sm:$0xf0]  ;;  %v1677_v7 = vor.u32 %v2023_v2, %v1676_v1  ;;  %v1604_v10 = vld [vmem:[%s2582_s28 + $0x90] sm:$0xf]  ;;  %v1541_v18 = vor.u32 %v1989_v9, %v1540_v8 }
  0x57   : > { %829 = vmatpush.bf16.msra.mxu2 %v1693_v47  ;;  %v1741_v11 = vor.u32 %v2039_v4, %v1740_v3  ;;  %v2005_v12 = vld [vmem:[%s2582_s28 + $0x94] sm:$0xf0]  ;;  %v1668_v13 = vld [vmem:[%s2582_s28 + $0x110] sm:$0xf]  ;;  %v1532_v17 = vld [vmem:[%s2582_s28] sm:$0xf] }
  0x58   : > { %843 = vmatpush.bf16.msra.mxu3 %v1757_v51  ;;  %v2021_v14 = vld [vmem:[%s2582_s28 + $0x114] sm:$0xf0]  ;;  %v1732_v15 = vld [vmem:[%s2582_s28 + $0x190] sm:$0xf]  ;;  %v1987_v19 = vld [vmem:[%s2582_s28 + $0x4] sm:$0xf0]  ;;  %v1605_v22 = vor.u32 %v2005_v12, %v1604_v10 }
  0x59   : > { %802 = vmatpush.bf16.msra.mxu0 %v1557_v57  ;;  %v2037_v16 = vld [vmem:[%s2582_s28 + $0x194] sm:$0xf0]  ;;  %v1596_v20 = vld [vmem:[%s2582_s28 + $0x80] sm:$0xf]  ;;  %v2003_v21 = vld [vmem:[%s2582_s28 + $0x84] sm:$0xf0]  ;;  %v1669_v23 = vor.u32 %v2021_v14, %v1668_v13  ;;  %v1533_v34 = vor.u32 %v1987_v19, %v1532_v17 }
  0x5a   : > { %816 = vmatpush.bf16.msra.mxu1 %v1621_v58  ;;  %v1660_v24 = vld [vmem:[%s2582_s28 + $0x100] sm:$0xf]  ;;  %v2019_v25 = vld [vmem:[%s2582_s28 + $0x104] sm:$0xf0]  ;;  %v1733_v27 = vor.u32 %v2037_v16, %v1732_v15  ;;  %v2000_v29 = vld [vmem:[%s2582_s28 + $0x74] sm:$0xf]  ;;  %v1597_v38 = vor.u32 %v2003_v21, %v1596_v20 }
  0x5b   : > { %830 = vmatpush.bf16.msra.mxu2 %v1685_v59  ;;  %v1724_v26 = vld [vmem:[%s2582_s28 + $0x180] sm:$0xf]  ;;  %v2035_v28 = vld [vmem:[%s2582_s28 + $0x184] sm:$0xf0]  ;;  %v1590_v30 = vld [vmem:[%s2582_s28 + $0x78] sm:$0xf0]  ;;  %v1661_v39 = vor.u32 %v2019_v25, %v1660_v24 }
  0x5c   : > { %844 = vmatpush.bf16.msra.mxu3 %v1749_v63  ;;  %v2016_v31 = vld [vmem:[%s2582_s28 + $0xf4] sm:$0xf]  ;;  %v1654_v32 = vld [vmem:[%s2582_s28 + $0xf8] sm:$0xf0]  ;;  %v1998_v40 = vld [vmem:[%s2582_s28 + $0x64] sm:$0xf]  ;;  %v1725_v44 = vor.u32 %v2035_v28, %v1724_v26  ;;  %v1593_v45 = vor.u32 %v2000_v29, %v1590_v30 }
  0x5d   : > { %803 = vmatpush.bf16.msra.mxu0 %v1549_v5  ;;  %v2032_v33 = vld [vmem:[%s2582_s28 + $0x174] sm:$0xf]  ;;  %v1718_v35 = vld [vmem:[%s2582_s28 + $0x178] sm:$0xf0]  ;;  %v1582_v41 = vld [vmem:[%s2582_s28 + $0x68] sm:$0xf0]  ;;  %v1657_v50 = vor.u32 %v2016_v31, %v1654_v32 }
  0x5e   : > { %817 = vmatpush.bf16.msra.mxu1 %v1613_v6  ;;  %v2048_v36 = vld [vmem:[%s2582_s28 + $0x1f4] sm:$0xf]  ;;  %v1782_v37 = vld [vmem:[%s2582_s28 + $0x1f8] sm:$0xf0]  ;;  %v2014_v46 = vld [vmem:[%s2582_s28 + $0xe4] sm:$0xf]  ;;  %v1721_v51 = vor.u32 %v2032_v33, %v1718_v35  ;;  %v1585_v0 = vor.u32 %v1998_v40, %v1582_v41 }
  0x5f   : > { %831 = vmatpush.bf16.msra.mxu2 %v1677_v7  ;;  %v404_v42 = vld [vmem:[%s2575_s23 + $0x10] sm:$0xff]  ;;  %v1646_v47 = vld [vmem:[%s2582_s28 + $0xe8] sm:$0xf0]  ;;  %v2030_v48 = vld [vmem:[%s2582_s28 + $0x164] sm:$0xf]  ;;  %v1785_v55 = vor.u32 %v2048_v36, %v1782_v37  ;;  %p1786_p1 = scmp.ne.s32.totalorder %s2406_s29, 1 }
  0x60   : > { %845 = vmatpush.bf16.msra.mxu3 %v1741_v11  ;;  %v408_v43 = vld [vmem:[%s2575_s23 + $0x30] sm:$0xff]  ;;  %v1710_v49 = vld [vmem:[%s2582_s28 + $0x168] sm:$0xf0]  ;;  %v405_v52 = vld [vmem:[%s2575_s23 + $0x18] sm:$0xff]  ;;  %v1649_v2 = vor.u32 %v2014_v46, %v1646_v47  ;;  %s922_s16 = sld [smem:[#allocation3]] (!%p1786_p1) }
  0x61   : > { %804 = vmatpush.bf16.msra.mxu0 %v1541_v18  ;;  %v409_v53 = vld [vmem:[%s2575_s23 + $0x38] sm:$0xff]  ;;  %v402_v54 = vld [vmem:[%s2575_s23] sm:$0xff]  ;;  %v2680_v56 = vpack.c.bf16 %v408_v43, %v404_v42  ;;  %v403_v58 = vld [vmem:[%s2575_s23 + $0x8] sm:$0xff]  ;;  %v1713_v3 = vor.u32 %v2030_v48, %v1710_v49 }
  0x62   : > { %818 = vmatpush.bf16.msra.mxu1 %v1605_v22  ;;  %v406_v57 = vld [vmem:[%s2575_s23 + $0x20] sm:$0xff]  ;;  %v407_v59 = vld [vmem:[%s2575_s23 + $0x28] sm:$0xff]  ;;  %v2687_v62 = vpack.c.bf16 %v409_v53, %v405_v52  ;;  %v1996_v4 = vld [vmem:[%s2582_s28 + $0x54] sm:$0xf] }
  0x63   : > { %832 = vmatpush.bf16.msra.mxu2 %v1669_v23  ;;  %v2046_v60 = vld [vmem:[%s2582_s28 + $0x1e4] sm:$0xf]  ;;  %v1774_v61 = vld [vmem:[%s2582_s28 + $0x1e8] sm:$0xf0]  ;;  %v2689_v63 = vpack.c.bf16 %v406_v57, %v402_v54  ;;  %v2691_v1 = vpack.c.bf16 %v407_v59, %v403_v58  ;;  %v1574_v5 = vld [vmem:[%s2582_s28 + $0x58] sm:$0xf0] }
  0x64   : > { %846 = vmatpush.bf16.msra.mxu3 %v1733_v27  ;;  %v2012_v6 = vld [vmem:[%s2582_s28 + $0xd4] sm:$0xf]  ;;  %v1777_v7 = vor.u32 %v2046_v60, %v1774_v61  ;;  %v1638_v8 = vld [vmem:[%s2582_s28 + $0xd8] sm:$0xf0]  ;;  %v1577_v13 = vor.u32 %v1996_v4, %v1574_v5  ;;  %v1994_v16 = vld [vmem:[%s2582_s28 + $0x44] sm:$0xf] }
  0x65   : > { %805 = vmatpush.bf16.msra.mxu0 %v1533_v34  ;;  %v2028_v9 = vld [vmem:[%s2582_s28 + $0x154] sm:$0xf]  ;;  %v1702_v10 = vld [vmem:[%s2582_s28 + $0x158] sm:$0xf0]  ;;  %v1641_v14 = vor.u32 %v2012_v6, %v1638_v8  ;;  %v1566_v17 = vld [vmem:[%s2582_s28 + $0x48] sm:$0xf0] }
  0x66   : > { %819 = vmatpush.bf16.msra.mxu1 %v1597_v38  ;;  %v2044_v11 = vld [vmem:[%s2582_s28 + $0x1d4] sm:$0xf]  ;;  %v1766_v12 = vld [vmem:[%s2582_s28 + $0x1d8] sm:$0xf0]  ;;  %v1705_v15 = vor.u32 %v2028_v9, %v1702_v10  ;;  %v2010_v18 = vld [vmem:[%s2582_s28 + $0xc4] sm:$0xf]  ;;  %v1569_v25 = vor.u32 %v1994_v16, %v1566_v17 }
  0x67   : > { %833 = vmatpush.bf16.msra.mxu2 %v1661_v39  ;;  %v1769_v19 = vor.u32 %v2044_v11, %v1766_v12  ;;  %v1630_v20 = vld [vmem:[%s2582_s28 + $0xc8] sm:$0xf0]  ;;  %v2026_v21 = vld [vmem:[%s2582_s28 + $0x144] sm:$0xf]  ;;  %v1992_v28 = vld [vmem:[%s2582_s28 + $0x34] sm:$0xf] }
  0x68   : > { %847 = vmatpush.bf16.msra.mxu3 %v1725_v44  ;;  %806 = vmatmul.bf16.vlgmr.msra.gmra.mxu0 %v2689_v63  ;;  %v1694_v22 = vld [vmem:[%s2582_s28 + $0x148] sm:$0xf0]  ;;  %v2042_v23 = vld [vmem:[%s2582_s28 + $0x1c4] sm:$0xf]  ;;  %v1633_v26 = vor.u32 %v2010_v18, %v1630_v20  ;;  %v1558_v29 = vld [vmem:[%s2582_s28 + $0x38] sm:$0xf0] }
  0x69   : > { %854 = vmatpush.bf16.msrb.mxu0 %v1593_v45  ;;  %820 = vmatmul.bf16.vlgmr.msra.gmra.mxu1 %v2691_v1  ;;  %v1758_v24 = vld [vmem:[%s2582_s28 + $0x1c8] sm:$0xf0]  ;;  %v1697_v27 = vor.u32 %v2026_v21, %v1694_v22  ;;  %v2008_v30 = vld [vmem:[%s2582_s28 + $0xb4] sm:$0xf]  ;;  %v1622_v32 = vld [vmem:[%s2582_s28 + $0xb8] sm:$0xf0]  ;;  %v1561_v37 = vor.u32 %v1992_v28, %v1558_v29 }
  0x6a   : > { %868 = vmatpush.bf16.msrb.mxu1 %v1657_v50  ;;  %834 = vmatmul.bf16.vlgmr.msra.gmra.mxu2 %v2680_v56  ;;  %v1761_v31 = vor.u32 %v2042_v23, %v1758_v24  ;;  %v2024_v33 = vld [vmem:[%s2582_s28 + $0x134] sm:$0xf]  ;;  %v1686_v34 = vld [vmem:[%s2582_s28 + $0x138] sm:$0xf0]  ;;  %v1625_v38 = vor.u32 %v2008_v30, %v1622_v32  ;;  %v1990_v40 = vld [vmem:[%s2582_s28 + $0x24] sm:$0xf] }
  0x6b   : > { %882 = vmatpush.bf16.msrb.mxu2 %v1721_v51  ;;  %848 = vmatmul.bf16.vlgmr.msra.gmra.mxu3 %v2687_v62  ;;  %v2040_v35 = vld [vmem:[%s2582_s28 + $0x1b4] sm:$0xf]  ;;  %v1750_v36 = vld [vmem:[%s2582_s28 + $0x1b8] sm:$0xf0]  ;;  %v1689_v39 = vor.u32 %v2024_v33, %v1686_v34  ;;  %v1550_v41 = vld [vmem:[%s2582_s28 + $0x28] sm:$0xf0] }
  0x6c   : > { %896 = vmatpush.bf16.msrb.mxu3 %v1785_v55  ;;  %v2006_v42 = vld [vmem:[%s2582_s28 + $0xa4] sm:$0xf]  ;;  %v1753_v43 = vor.u32 %v2040_v35, %v1750_v36  ;;  %v1614_v44 = vld [vmem:[%s2582_s28 + $0xa8] sm:$0xf0]  ;;  %v1553_v49 = vor.u32 %v1990_v40, %v1550_v41  ;;  %v1988_v52 = vld [vmem:[%s2582_s28 + $0x14] sm:$0xf] }
  0x6d   : > { %855 = vmatpush.bf16.msrb.mxu0 %v1585_v0  ;;  %v2022_v45 = vld [vmem:[%s2582_s28 + $0x124] sm:$0xf]  ;;  %v1678_v46 = vld [vmem:[%s2582_s28 + $0x128] sm:$0xf0]  ;;  %v1617_v50 = vor.u32 %v2006_v42, %v1614_v44  ;;  %v1542_v53 = vld [vmem:[%s2582_s28 + $0x18] sm:$0xf0] }
  0x6e   : > { %869 = vmatpush.bf16.msrb.mxu1 %v1649_v2  ;;  %v2038_v47 = vld [vmem:[%s2582_s28 + $0x1a4] sm:$0xf]  ;;  %v1742_v48 = vld [vmem:[%s2582_s28 + $0x1a8] sm:$0xf0]  ;;  %v1681_v51 = vor.u32 %v2022_v45, %v1678_v46  ;;  %v2004_v54 = vld [vmem:[%s2582_s28 + $0x94] sm:$0xf]  ;;  %v1545_v0 = vor.u32 %v1988_v52, %v1542_v53 }
  0x6f   : > { %883 = vmatpush.bf16.msrb.mxu2 %v1713_v3  ;;  %v1745_v55 = vor.u32 %v2038_v47, %v1742_v48  ;;  %v1606_v57 = vld [vmem:[%s2582_s28 + $0x98] sm:$0xf0]  ;;  %v2020_v58 = vld [vmem:[%s2582_s28 + $0x114] sm:$0xf]  ;;  %v1986_v4 = vld [vmem:[%s2582_s28 + $0x4] sm:$0xf] }
  0x70   : > { %897 = vmatpush.bf16.msrb.mxu3 %v1777_v7  ;;  %v1670_v59 = vld [vmem:[%s2582_s28 + $0x118] sm:$0xf0]  ;;  %v2036_v60 = vld [vmem:[%s2582_s28 + $0x194] sm:$0xf]  ;;  %v1609_v2 = vor.u32 %v2004_v54, %v1606_v57  ;;  %v1534_v5 = vld [vmem:[%s2582_s28 + $0x8] sm:$0xf0] }
  0x71   : > { %856 = vmatpush.bf16.msrb.mxu0 %v1577_v13  ;;  %v1734_v61 = vld [vmem:[%s2582_s28 + $0x198] sm:$0xf0]  ;;  %v1673_v3 = vor.u32 %v2020_v58, %v1670_v59  ;;  %v2002_v6 = vld [vmem:[%s2582_s28 + $0x84] sm:$0xf]  ;;  %v1598_v8 = vld [vmem:[%s2582_s28 + $0x88] sm:$0xf0]  ;;  %v1537_v13 = vor.u32 %v1986_v4, %v1534_v5 }
  0x72   : > { %870 = vmatpush.bf16.msrb.mxu1 %v1641_v14  ;;  %v1737_v7 = vor.u32 %v2036_v60, %v1734_v61  ;;  %v2018_v9 = vld [vmem:[%s2582_s28 + $0x104] sm:$0xf]  ;;  %v1662_v10 = vld [vmem:[%s2582_s28 + $0x108] sm:$0xf0]  ;;  %v1601_v14 = vor.u32 %v2002_v6, %v1598_v8  ;;  %v398_v23 = vld [vmem:[#allocation2 + $0x10] sm:$0xff] }
  0x73   : > { %884 = vmatpush.bf16.msrb.mxu2 %v1705_v15  ;;  %v2034_v11 = vld [vmem:[%s2582_s28 + $0x184] sm:$0xf]  ;;  %v1726_v12 = vld [vmem:[%s2582_s28 + $0x188] sm:$0xf0]  ;;  %v1665_v15 = vor.u32 %v2018_v9, %v1662_v10  ;;  %v400_v30 = vld [vmem:[#allocation2 + $0x18] sm:$0xff] }
  0x74   : > { %898 = vmatpush.bf16.msrb.mxu3 %v1769_v19  ;;  %v1729_v16 = vor.u32 %v2034_v11, %v1726_v12  ;;  %v401_v45 = vld [vmem:[#allocation2 + $0x8] sm:$0xff] }
  0x75   : > { %857 = vmatpush.bf16.msrb.mxu0 %v1569_v25 }
  0x76   : > { %871 = vmatpush.bf16.msrb.mxu1 %v1633_v26 }
  0x77   : > { %885 = vmatpush.bf16.msrb.mxu2 %v1697_v27 }
  0x78   : > { %899 = vmatpush.bf16.msrb.mxu3 %v1761_v31 }
  0x79   : > { %858 = vmatpush.bf16.msrb.mxu0 %v1561_v37  ;;  %v399_v37 = vld [vmem:[#allocation2] sm:$0xff] }
  0x7a   : > { %872 = vmatpush.bf16.msrb.mxu1 %v1625_v38 }
  0x7b   : > { %886 = vmatpush.bf16.msrb.mxu2 %v1689_v39 }
  0x7c   : > { %900 = vmatpush.bf16.msrb.mxu3 %v1753_v43 }
  0x7d   : > { %859 = vmatpush.bf16.msrb.mxu0 %v1553_v49 }
  0x7e   : > { %873 = vmatpush.bf16.msrb.mxu1 %v1617_v50 }
  0x7f   : > { %887 = vmatpush.bf16.msrb.mxu2 %v1681_v51 }
  0x80   : > { %901 = vmatpush.bf16.msrb.mxu3 %v1745_v55 }
  0x81   : > { %860 = vmatpush.bf16.msrb.mxu0 %v1545_v0 }
  0x82   : > { %874 = vmatpush.bf16.msrb.mxu1 %v1609_v2 }
  0x83   : > { %888 = vmatpush.bf16.msrb.mxu2 %v1673_v3 }
  0x84   : > { %902 = vmatpush.bf16.msrb.mxu3 %v1737_v7 }
  0x85   : > { %861 = vmatpush.bf16.msrb.mxu0 %v1537_v13 }
  0x86   : > { %875 = vmatpush.bf16.msrb.mxu1 %v1601_v14 }
  0x87   : > { %889 = vmatpush.bf16.msrb.mxu2 %v1665_v15 }
  0x88   : > { %903 = vmatpush.bf16.msrb.mxu3 %v1729_v16  ;;  %862 = vmatmul.bf16.vlgmr.msrb.gmra.mxu0 %v2689_v63 }
  0x89   : > { %876 = vmatmul.bf16.vlgmr.msrb.gmra.mxu1 %v2691_v1 }
  0x8a   : > { %890 = vmatmul.bf16.vlgmr.msrb.gmra.mxu2 %v2680_v56 }
  0x8b   : > { %904 = vmatmul.bf16.vlgmr.msrb.gmra.mxu3 %v2687_v62 }
  0xe5   : > { %v807_v17 = vpop.f32.mrf.mxu0 }
  0xe6   : > { %v821_v18 = vpop.f32.mrf.mxu1 }
  0xe7   : > { %v822_v19 = vadd.f32 %v821_v18, %v807_v17 }
  0xed   : > { %v835_v20 = vpop.f32.mrf.mxu2  ;;  %v809_v25 = vpop.f32.mrf.mxu0 }
  0xee   : > { %v836_v21 = vadd.f32 %v835_v20, %v822_v19  ;;  %v849_v22 = vpop.f32.mrf.mxu3  ;;  %v823_v26 = vpop.f32.mrf.mxu1 }
  0xef   : > { %v824_v28 = vadd.f32 %v823_v26, %v809_v25 }
  0xf0   : > { %v850_v24 = vadd.f32 %v849_v22, %v836_v21 }
  0xf2   : > { %v910_v27 = vadd.f32 %v850_v24, %v398_v23 }
  0xf4   : > { %914 = vst [vmem:[#allocation2 + $0x10] sm:$0xff] %v910_v27 }
  0xf5   : > { %v837_v63 = vpop.f32.mrf.mxu2 }
  0xf6   : > { %v838_v29 = vadd.f32 %v837_v63, %v824_v28  ;;  %v851_v1 = vpop.f32.mrf.mxu3 }
  0xf8   : > { %v852_v56 = vadd.f32 %v851_v1, %v838_v29 }
  0xfa   : > { %v912_v31 = vadd.f32 %v852_v56, %v400_v30 }
  0xfc   : > { %916 = vst [vmem:[#allocation2 + $0x18] sm:$0xff] %v912_v31 }
 0x105   : > { %v863_v62 = vpop.f32.mrf.mxu0 }
 0x106   : > { %v877_v32 = vpop.f32.mrf.mxu1 }
 0x107   : > { %v878_v33 = vadd.f32 %v877_v32, %v863_v62 }
 0x10d   : > { %v891_v34 = vpop.f32.mrf.mxu2  ;;  %v865_v39 = vpop.f32.mrf.mxu0 }
 0x10e   : > { %v892_v35 = vadd.f32 %v891_v34, %v878_v33  ;;  %v905_v36 = vpop.f32.mrf.mxu3  ;;  %v879_v40 = vpop.f32.mrf.mxu1 }
 0x10f   : > { %v880_v42 = vadd.f32 %v879_v40, %v865_v39 }
 0x110   : > { %v906_v38 = vadd.f32 %v905_v36, %v892_v35 }
 0x112   : > { %v911_v41 = vadd.f32 %v906_v38, %v399_v37 }
 0x114   : > { %915 = vst [vmem:[#allocation2] sm:$0xff] %v911_v41 }
 0x115   : > { %v893_v43 = vpop.f32.mrf.mxu2 }
 0x116   : > { %v894_v44 = vadd.f32 %v893_v43, %v880_v42  ;;  %v907_v46 = vpop.f32.mrf.mxu3 }
 0x118   : > { %v908_v47 = vadd.f32 %v907_v46, %v894_v44  ;;  %921 = sbr.rel (%p1786_p1) target bundleno = 747 (0x2eb), region = 72 }
 0x11a   : > { %v913_v48 = vadd.f32 %v908_v47, %v401_v45 }
 0x11c   : > { %917 = vst [vmem:[#allocation2 + $0x8] sm:$0xff] %v913_v48 }
 0x11d   : > { %v1845_v49 = vld [vmem:[#allocation9 + $0x70] sm:$0xf]  ;;  %v2065_v50 = vld [vmem:[#allocation9 + $0x74] sm:$0xf0]  ;;  %v2064_v54 = vld [vmem:[#allocation9 + $0x74] sm:$0xf] }
 0x11e   : > { %v1909_v51 = vld [vmem:[#allocation9 + $0xf0] sm:$0xf]  ;;  %v1846_v52 = vor.u32 %v2065_v50, %v1845_v49  ;;  %v2081_v53 = vld [vmem:[#allocation9 + $0xf4] sm:$0xf0]  ;;  %v1847_v55 = vld [vmem:[#allocation9 + $0x78] sm:$0xf0] }
 0x11f   : > { %v1910_v57 = vor.u32 %v2081_v53, %v1909_v51  ;;  %v1850_v58 = vor.u32 %v2064_v54, %v1847_v55  ;;  %v2080_v59 = vld [vmem:[#allocation9 + $0xf4] sm:$0xf]  ;;  %v1911_v60 = vld [vmem:[#allocation9 + $0xf8] sm:$0xf0]  ;;  %v1837_v61 = vld [vmem:[#allocation9 + $0x60] sm:$0xf] }
 0x120   : > { %1137 = vmatpush.bf16.msra.mxu0 %v1846_v52  ;;  %v1914_v0 = vor.u32 %v2080_v59, %v1911_v60  ;;  %v2063_v2 = vld [vmem:[#allocation9 + $0x64] sm:$0xf0]  ;;  %v1901_v3 = vld [vmem:[#allocation9 + $0xe0] sm:$0xf]  ;;  %v2062_v7 = vld [vmem:[#allocation9 + $0x64] sm:$0xf] }
 0x121   : > { %v2079_v4 = vld [vmem:[#allocation9 + $0xe4] sm:$0xf0]  ;;  %1151 = vmatpush.bf16.msra.mxu1 %v1910_v57  ;;  %1165 = vmatpush.bf16.msra.mxu2 %v1850_v58  ;;  %v1838_v5 = vor.u32 %v2063_v2, %v1837_v61  ;;  %v1839_v8 = vld [vmem:[#allocation9 + $0x68] sm:$0xf0]  ;;  %v2078_v9 = vld [vmem:[#allocation9 + $0xe4] sm:$0xf] }
 0x122   : > { %v1902_v6 = vor.u32 %v2079_v4, %v1901_v3  ;;  %1179 = vmatpush.bf16.msra.mxu3 %v1914_v0  ;;  %v1842_v10 = vor.u32 %v2062_v7, %v1839_v8  ;;  %v1903_v11 = vld [vmem:[#allocation9 + $0xe8] sm:$0xf0]  ;;  %v1829_v12 = vld [vmem:[#allocation9 + $0x50] sm:$0xf]  ;;  %v2061_v13 = vld [vmem:[#allocation9 + $0x54] sm:$0xf0] }
 0x123   : > { %v1906_v14 = vor.u32 %v2078_v9, %v1903_v11  ;;  %v1893_v15 = vld [vmem:[#allocation9 + $0xd0] sm:$0xf]  ;;  %v2077_v16 = vld [vmem:[#allocation9 + $0xd4] sm:$0xf0]  ;;  %v2060_v17 = vld [vmem:[#allocation9 + $0x54] sm:$0xf]  ;;  %v1830_v18 = vor.u32 %v2061_v13, %v1829_v12 }
 0x124   : > { %1138 = vmatpush.bf16.msra.mxu0 %v1838_v5  ;;  %v1831_v19 = vld [vmem:[#allocation9 + $0x58] sm:$0xf0]  ;;  %v2076_v20 = vld [vmem:[#allocation9 + $0xd4] sm:$0xf]  ;;  %v1894_v22 = vor.u32 %v2077_v16, %v1893_v15  ;;  %v1821_v24 = vld [vmem:[#allocation9 + $0x40] sm:$0xf] }
 0x125   : > { %v1895_v21 = vld [vmem:[#allocation9 + $0xd8] sm:$0xf0]  ;;  %1152 = vmatpush.bf16.msra.mxu1 %v1902_v6  ;;  %1166 = vmatpush.bf16.msra.mxu2 %v1842_v10  ;;  %v1834_v23 = vor.u32 %v2060_v17, %v1831_v19  ;;  %v2059_v25 = vld [vmem:[#allocation9 + $0x44] sm:$0xf0]  ;;  %v1885_v26 = vld [vmem:[#allocation9 + $0xc0] sm:$0xf] }
 0x126   : > { %1180 = vmatpush.bf16.msra.mxu3 %v1906_v14  ;;  %v1898_v27 = vor.u32 %v2076_v20, %v1895_v21  ;;  %v2075_v28 = vld [vmem:[#allocation9 + $0xc4] sm:$0xf0]  ;;  %v2058_v63 = vld [vmem:[#allocation9 + $0x44] sm:$0xf]  ;;  %v1823_v29 = vld [vmem:[#allocation9 + $0x48] sm:$0xf0]  ;;  %v1822_v56 = vor.u32 %v2059_v25, %v1821_v24 }
 0x127   : > { %v2074_v1 = vld [vmem:[#allocation9 + $0xc4] sm:$0xf]  ;;  %v1887_v30 = vld [vmem:[#allocation9 + $0xc8] sm:$0xf0]  ;;  %v1886_v31 = vor.u32 %v2075_v28, %v1885_v26  ;;  %v1826_v62 = vor.u32 %v2058_v63, %v1823_v29  ;;  %v1813_v32 = vld [vmem:[#allocation9 + $0x30] sm:$0xf] }
 0x128   : > { %1139 = vmatpush.bf16.msra.mxu0 %v1830_v18  ;;  %v2057_v33 = vld [vmem:[#allocation9 + $0x34] sm:$0xf0]  ;;  %v1877_v34 = vld [vmem:[#allocation9 + $0xb0] sm:$0xf]  ;;  %v1890_v35 = vor.u32 %v2074_v1, %v1887_v30  ;;  %v2056_v37 = vld [vmem:[#allocation9 + $0x34] sm:$0xf] }
 0x129   : > { %1153 = vmatpush.bf16.msra.mxu1 %v1894_v22  ;;  %1167 = vmatpush.bf16.msra.mxu2 %v1834_v23  ;;  %v2073_v36 = vld [vmem:[#allocation9 + $0xb4] sm:$0xf0]  ;;  %v1815_v38 = vld [vmem:[#allocation9 + $0x38] sm:$0xf0]  ;;  %v2072_v39 = vld [vmem:[#allocation9 + $0xb4] sm:$0xf]  ;;  %v1814_v41 = vor.u32 %v2057_v33, %v1813_v32 }
 0x12a   : > { %1181 = vmatpush.bf16.msra.mxu3 %v1898_v27  ;;  %v1879_v40 = vld [vmem:[#allocation9 + $0xb8] sm:$0xf0]  ;;  %v1878_v42 = vor.u32 %v2073_v36, %v1877_v34  ;;  %v1818_v43 = vor.u32 %v2056_v37, %v1815_v38  ;;  %v1805_v44 = vld [vmem:[#allocation9 + $0x20] sm:$0xf]  ;;  %v2055_v45 = vld [vmem:[#allocation9 + $0x24] sm:$0xf0] }
 0x12b   : > { %v1869_v46 = vld [vmem:[#allocation9 + $0xa0] sm:$0xf]  ;;  %v1882_v47 = vor.u32 %v2072_v39, %v1879_v40  ;;  %v2071_v48 = vld [vmem:[#allocation9 + $0xa4] sm:$0xf0]  ;;  %v2054_v49 = vld [vmem:[#allocation9 + $0x24] sm:$0xf]  ;;  %v1806_v53 = vor.u32 %v2055_v45, %v1805_v44 }
 0x12c   : > { %1140 = vmatpush.bf16.msra.mxu0 %v1822_v56  ;;  %v1807_v50 = vld [vmem:[#allocation9 + $0x28] sm:$0xf0]  ;;  %v2070_v51 = vld [vmem:[#allocation9 + $0xa4] sm:$0xf]  ;;  %v1797_v54 = vld [vmem:[#allocation9 + $0x10] sm:$0xf]  ;;  %v1870_v55 = vor.u32 %v2071_v48, %v1869_v46 }
 0x12d   : > { %1154 = vmatpush.bf16.msra.mxu1 %v1886_v31  ;;  %1168 = vmatpush.bf16.msra.mxu2 %v1826_v62  ;;  %v1871_v52 = vld [vmem:[#allocation9 + $0xa8] sm:$0xf0]  ;;  %v1810_v57 = vor.u32 %v2054_v49, %v1807_v50  ;;  %v2053_v58 = vld [vmem:[#allocation9 + $0x14] sm:$0xf0]  ;;  %v1861_v59 = vld [vmem:[#allocation9 + $0x90] sm:$0xf] }
 0x12e   : > { %1182 = vmatpush.bf16.msra.mxu3 %v1890_v35  ;;  %v2069_v60 = vld [vmem:[#allocation9 + $0x94] sm:$0xf0]  ;;  %v1874_v61 = vor.u32 %v2070_v51, %v1871_v52  ;;  %v2052_v0 = vld [vmem:[#allocation9 + $0x14] sm:$0xf]  ;;  %v1799_v2 = vld [vmem:[#allocation9 + $0x18] sm:$0xf0]  ;;  %v1798_v7 = vor.u32 %v2053_v58, %v1797_v54 }
 0x12f   : > { %v2068_v3 = vld [vmem:[#allocation9 + $0x94] sm:$0xf]  ;;  %v1863_v4 = vld [vmem:[#allocation9 + $0x98] sm:$0xf0]  ;;  %v1789_v5 = vld [vmem:[#allocation9] sm:$0xf]  ;;  %v1862_v13 = vor.u32 %v2069_v60, %v1861_v59  ;;  %v1802_v14 = vor.u32 %v2052_v0, %v1799_v2 }
 0x130   : > { %1141 = vmatpush.bf16.msra.mxu0 %v1814_v41  ;;  %v927_v6 = vld [vmem:[%s2801_s3] sm:$0x3]  ;;  %v2051_v8 = vld [vmem:[#allocation9 + $0x4] sm:$0xf0]  ;;  %v923_v9 = vld [vmem:[#allocation2 + $0x10] sm:$0xff]  ;;  %v1866_v18 = vor.u32 %v2068_v3, %v1863_v4 }
 0x131   : > { %1155 = vmatpush.bf16.msra.mxu1 %v1878_v42  ;;  %1169 = vmatpush.bf16.msra.mxu2 %v1818_v43  ;;  %v925_v10 = vld [vmem:[#allocation2 + $0x18] sm:$0xff]  ;;  %v929_v11 = vperm.slane %v927_v6, 0  ;;  %v930_v12 = vperm.slane %v927_v6, 1  ;;  %v1853_v15 = vld [vmem:[#allocation9 + $0x80] sm:$0xf]  ;;  %v926_v17 = vld [vmem:[#allocation2 + $0x8] sm:$0xff]  ;;  %v1790_v26 = vor.u32 %v2051_v8, %v1789_v5 }
 0x132   : > { %1183 = vmatpush.bf16.msra.mxu3 %v1882_v47  ;;  %v924_v16 = vld [vmem:[#allocation2] sm:$0xff]  ;;  %v2067_v19 = vld [vmem:[#allocation9 + $0x84] sm:$0xf0]  ;;  %v1791_v21 = vld [vmem:[#allocation9 + $0x8] sm:$0xf0] }
 0x133   : > { %v2050_v20 = vld [vmem:[#allocation9 + $0x4] sm:$0xf]  ;;  %v1855_v23 = vld [vmem:[#allocation9 + $0x88] sm:$0xf0]  ;;  %v933_v24 = vadd.f32 %v929_v11, %v923_v9  ;;  %v935_v25 = vadd.f32 %v929_v11, %v925_v10  ;;  %v934_v27 = vadd.f32 %v930_v12, %v924_v16  ;;  %v936_v28 = vadd.f32 %v930_v12, %v926_v17  ;;  %v971_v31 = vld [vmem:[%s2803_s5] sm:$0x3] }
 0x134   : > { %1142 = vmatpush.bf16.msra.mxu0 %v1806_v53  ;;  %v2066_v22 = vld [vmem:[#allocation9 + $0x84] sm:$0xf]  ;;  %v1854_v63 = vor.u32 %v2067_v19, %v1853_v15  ;;  %v1794_v29 = vor.u32 %v2050_v20, %v1791_v21  ;;  %v973_v62 = vperm.slane %v971_v31, 0  ;;  %v974_v34 = vperm.slane %v971_v31, 1  ;;  %v2088_v58 = vld [vmem:[#allocation10 + $0x30] sm:$0xff]  ;;  %v2087_v60 = vld [vmem:[#allocation10 + $0x28] sm:$0xff] }
 0x135   : > { %1156 = vmatpush.bf16.msra.mxu1 %v1870_v55  ;;  %1170 = vmatpush.bf16.msra.mxu2 %v1810_v57  ;;  %v1858_v1 = vor.u32 %v2066_v22, %v1855_v23  ;;  %v937_v30 = vpack.c.bf16 %v935_v25, %v933_v24  ;;  %v938_v56 = vpack.c.bf16 %v936_v28, %v934_v27  ;;  %v2089_v55 = vld [vmem:[#allocation10 + $0x38] sm:$0xff]  ;;  %v2096_v59 = vld [vmem:[#allocation10 + $0x70] sm:$0xff]  ;;  %v2086_v0 = vld [vmem:[#allocation10 + $0x20] sm:$0xff]  ;;  %v1225_v27 = vstv %s922_s16 }
 0x136   : > { %1184 = vmatpush.bf16.msra.mxu3 %v1874_v61  ;;  %v2097_v57 = vld [vmem:[#allocation10 + $0x78] sm:$0xff]  ;;  %v2095_v61 = vld [vmem:[#allocation10 + $0x68] sm:$0xff]  ;;  %v2094_v2 = vld [vmem:[#allocation10 + $0x60] sm:$0xff] }
 0x137   : > { %v2085_v3 = vld [vmem:[#allocation10 + $0x18] sm:$0xff]  ;;  %v2084_v5 = vld [vmem:[#allocation10 + $0x10] sm:$0xff]  ;;  %v2091_v8 = vld [vmem:[#allocation10 + $0x48] sm:$0xff] }
 0x138   : > { %1143 = vmatpush.bf16.msra.mxu0 %v1798_v7  ;;  %v2093_v4 = vld [vmem:[#allocation10 + $0x58] sm:$0xff]  ;;  %v2092_v6 = vld [vmem:[#allocation10 + $0x50] sm:$0xff]  ;;  %v2083_v7 = vld [vmem:[#allocation10 + $0x8] sm:$0xff] }
 0x139   : > { %1157 = vmatpush.bf16.msra.mxu1 %v1862_v13  ;;  %1171 = vmatpush.bf16.msra.mxu2 %v1802_v14  ;;  %v2082_v9 = vld [vmem:[#allocation10] sm:$0xff] }
 0x13a   : > { %1185 = vmatpush.bf16.msra.mxu3 %v1866_v18  ;;  %v2090_v10 = vld [vmem:[#allocation10 + $0x40] sm:$0xff] }
 0x13c   : > { %1144 = vmatpush.bf16.msra.mxu0 %v1790_v26 }
 0x13d   : > { %1158 = vmatpush.bf16.msra.mxu1 %v1854_v63  ;;  %1172 = vmatpush.bf16.msra.mxu2 %v1794_v29 }
 0x13e   : > { %1186 = vmatpush.bf16.msra.mxu3 %v1858_v1 }
 0x13f   : > { %1145 = vmatmul.bf16.vlgmr.msra.gmra.mxu0 %v937_v30 }
 0x140   : > { %1159 = vmatmul.bf16.vlgmr.msra.gmra.mxu1 %v938_v56  ;;  %1173 = vmatmul.bf16.vlgmr.msra.gmra.mxu2 %v937_v30 }
 0x141   : > { %1187 = vmatmul.bf16.vlgmr.msra.gmra.mxu3 %v938_v56  ;;  %1362 = vmatpush.bf16.msrb.mxu0 %v2089_v55 }
 0x142   : > { %1376 = vmatpush.bf16.msrb.mxu1 %v2097_v57 }
 0x145   : > { %1363 = vmatpush.bf16.msrb.mxu0 %v2088_v58 }
 0x146   : > { %1377 = vmatpush.bf16.msrb.mxu1 %v2096_v59 }
 0x149   : > { %1364 = vmatpush.bf16.msrb.mxu0 %v2087_v60 }
 0x14a   : > { %1378 = vmatpush.bf16.msrb.mxu1 %v2095_v61 }
 0x14d   : > { %1365 = vmatpush.bf16.msrb.mxu0 %v2086_v0 }
 0x14e   : > { %1379 = vmatpush.bf16.msrb.mxu1 %v2094_v2 }
 0x151   : > { %1366 = vmatpush.bf16.msrb.mxu0 %v2085_v3 }
 0x152   : > { %1380 = vmatpush.bf16.msrb.mxu1 %v2093_v4 }
 0x155   : > { %1367 = vmatpush.bf16.msrb.mxu0 %v2084_v5 }
 0x156   : > { %1381 = vmatpush.bf16.msrb.mxu1 %v2092_v6 }
 0x159   : > { %1368 = vmatpush.bf16.msrb.mxu0 %v2083_v7 }
 0x15a   : > { %1382 = vmatpush.bf16.msrb.mxu1 %v2091_v8 }
 0x15d   : > { %1369 = vmatpush.bf16.msrb.mxu0 %v2082_v9 }
 0x15e   : > { %1383 = vmatpush.bf16.msrb.mxu1 %v2090_v10 }
 0x1bc   : > { %v1146_v32 = vpop.f32.mrf.mxu0 }
 0x1bd   : > { %v1147_v33 = vadd.f32 %v1146_v32, %v973_v62  ;;  %v1160_v35 = vpop.f32.mrf.mxu1 }
 0x1bf   : > { %v2756_v36 = vadd.f32 %v1160_v35, %v1147_v33 }
 0x1c1   : > { %v1193_v42 = vmul.f32 %v2756_v36, %v2756_v36 }
 0x1c3   : > { %v1174_v37 = vpop.f32.mrf.mxu2 }
 0x1c4   : > { %v1175_v38 = vadd.f32 %v1174_v37, %v974_v34  ;;  %v1188_v39 = vpop.f32.mrf.mxu3  ;;  %v1148_v40 = vpop.f32.mrf.mxu0 }
 0x1c5   : > { %v1149_v43 = vadd.f32 %v1148_v40, %v973_v62  ;;  %v1162_v46 = vpop.f32.mrf.mxu1 }
 0x1c6   : > { %v2758_v41 = vadd.f32 %v1188_v39, %v1175_v38 }
 0x1c7   : > { %v2764_v48 = vadd.f32 %v1162_v46, %v1149_v43 }
 0x1c8   : > { %v1194_v44 = vmul.f32 %v2758_v41, %v2758_v41 }
 0x1c9   : > { %v1195_v52 = vmul.f32 %v2764_v48, %v2764_v48 }
 0x1ca   : > { %v1197_v45 = vadd.f32 %v1194_v44, %v1193_v42 }
 0x1cb   : > { %v1176_v47 = vpop.f32.mrf.mxu2 }
 0x1cc   : > { %v1177_v49 = vadd.f32 %v1176_v47, %v974_v34  ;;  %1198 = vadd.xlane.f32.xlu0 %v1197_v45  ;;  %v1190_v50 = vpop.f32.mrf.mxu3 }
 0x1ce   : > { %v2766_v51 = vadd.f32 %v1190_v50, %v1177_v49 }
 0x1d0   : > { %v1196_v53 = vmul.f32 %v2766_v51, %v2766_v51 }
 0x1d2   : > { %v1200_v54 = vadd.f32 %v1196_v53, %v1195_v52 }
 0x1d4   : > { %1201 = vadd.xlane.f32.xlu0 %v1200_v54 }
 0x23f   : > { %v1199_v11 = vpop.xlane.xlu0 %1198 }
 0x240   : > { %v1203_v12 = vmax.f32 %v1199_v11, 1e-24 }
 0x242   : > { %2196 = vrsqrt.f32 %v1203_v12  ;;  %vm1211_vm1 = vweird.f32 %v1203_v12 }
 0x247   : > { %v1202_v13 = vpop.xlane.xlu0 %1201 }
 0x248   : > { %v2197_v14 = vpop.eup %2196  ;;  %v1204_v15 = vmax.f32 %v1202_v13, 1e-24 }
 0x249   : > { %v1206_v16 = vmul.f32 %v2197_v14, %v1203_v12  ;;  %vm1212_vm0 = vweird.f32 %v2197_v14 }
 0x24a   : > { %2198 = vrsqrt.f32 %v1204_v15  ;;  %vm1213_vm2 = vmor %vm1211_vm1, %vm1212_vm0  ;;  %vm1221_vm4 = vweird.f32 %v1204_v15 }
 0x24b   : > { %v1207_v17 = vmul.f32 %v2197_v14, %v1206_v16 }
 0x24d   : > { %v1208_v18 = vmul.f32 0.5, %v1207_v17 }
 0x24f   : > { %v1209_v19 = vsub.f32 1.5, %v1208_v18 }
 0x250   : > { %v2199_v20 = vpop.eup %2198 }
 0x251   : > { %v1216_v21 = vmul.f32 %v2199_v20, %v1204_v15  ;;  %v1210_v22 = vmul.f32 %v2197_v14, %v1209_v19  ;;  %vm1222_vm3 = vweird.f32 %v2199_v20 }
 0x252   : > { %vm1223_vm5 = vmor %vm1221_vm4, %vm1222_vm3 }
 0x253   : > { %v1217_v23 = vmul.f32 %v2199_v20, %v1216_v21  ;;  %v1214_v25 = vsel %vm1213_vm2, %v2197_v14, %v1210_v22 }
 0x254   : > { %v1226_v63 = vmul.f32 %v1225_v27, %v1214_v25 }
 0x255   : > { %v1218_v24 = vmul.f32 0.5, %v1217_v23 }
 0x256   : > { %v1228_v30 = vmul.f32 %v1226_v63, %v2756_v36  ;;  %v1229_v31 = vmul.f32 %v1226_v63, %v2758_v41 }
 0x257   : > { %v1219_v26 = vsub.f32 1.5, %v1218_v24 }
 0x259   : > { %v1220_v28 = vmul.f32 %v2199_v20, %v1219_v26 }
 0x25b   : > { %v1224_v29 = vsel %vm1223_vm5, %v2199_v20, %v1220_v28 }
 0x25c   : > { %v1227_v1 = vmul.f32 %v1225_v27, %v1224_v29 }
 0x25e   : > { %v1230_v56 = vmul.f32 %v1227_v1, %v2764_v48  ;;  %v1231_v62 = vmul.f32 %v1227_v1, %v2766_v51 }
 0x260   : > { %v1232_v32 = vpack.c.bf16 %v1230_v56, %v1228_v30  ;;  %v1233_v33 = vpack.c.bf16 %v1231_v62, %v1229_v31 }
 0x262   : > { %1370 = vmatmul.bf16.vlgmr.msrb.gmra.mxu0 %v1232_v32  ;;  %1384 = vmatmul.bf16.vlgmr.msrb.gmra.mxu1 %v1233_v33 }
 0x2df   : > { %v1371_v34 = vpop.f32.mrf.mxu0  ;;  %v1385_v35 = vpop.f32.mrf.mxu1 }
 0x2e0   : > { %v1386_v37 = vadd.f32 %v1385_v35, %v1371_v34 }
 0x2e2   : > { %1390 = vst [vmem:[#allocation12] sm:$0xff] %v1386_v37 }
 0x2e7   : > { %v1373_v38 = vpop.f32.mrf.mxu0  ;;  %v1387_v39 = vpop.f32.mrf.mxu1 }
 0x2e8   : > { %v1388_v40 = vadd.f32 %v1387_v39, %v1373_v38 }
 0x2ea   : > { %1391 = vst [vmem:[#allocation12 + $0x8] sm:$0xff] %v1388_v40 }
 0x2eb PF: > { %p2133_p3 = scmp.eq.s32.totalorder %s2501_s0, 1  ;;  %s1402_s26 = sshll.u32 %s2805_s7, 4  ;;  %s1403_s26 = int_to_ptr.hbm [resolvable:$true] %s1402_s26 }
 0x2ec   : > { %s2426_s15 = smov [#allocation12]   ;;  %s2427_s17 = smov 128  }
 0x2ed   : > { %s1400_s14 = sshll.u32 %s2426_s15, 4  ;;  %s2428_s18 = smov 8   ;;  %s1401_s14 = int_to_ptr.vmem [resolvable:$true] %s1400_s14 }
 0x2ee   : > { %2111 = dma.vmem_to_hbm [thread:$0]  (%p2133_p3), %s1401_s14, 256, %s1403_s26, [#allocation6], %s2427_s17, %s2427_s17, %s2428_s18  }
 0x2ef   : > { %2389 = dma.done.wait (%p2133_p3), [#allocation6], 256  }
 0x2f0   : > { %2391 = vsyncadd (%p2133_p3), [#allocation6], 4294967040 }
 0x2f1 PF: > { %s26_s8 = sadd.s32 1, %s2414_s8   ;;  %s2825_s21 = sld [smem:[#allocation18_spill]] }
 0x2f2   : > { %p23_p4 = scmp.ge.s32.totalorder %s26_s8, 4   ;;  %s2826_s28 = sld [smem:[#allocation20_spill]] }
 0x2f3   : > { %s2827_s0 = sld [smem:[#allocation19_spill]]  ;;  %s2828_s26 = smov %s2398_s27 }
 0x2f4   : > { %s2830_s29 = smov %s2410_s30 }
 0x2f5   :  { %25 = sbr.rel (!%p23_p4) target bundleno = 13 (0xd), region = 115 }
 0x2f7   : > { %s2829_s27 = smov %s2825_s21 }
 0x2f9   : > { %s2831_s30 = smov %s2827_s0 }
 0x2fa   :  { %1419 = vsyncpa [#allocation5], 1 }
 0x2fb   :  { %1421 = vsyncpa [#allocation5 + $0x1], 1 }
 0x2fc   :  { %1422 = vsyncpa [#allocation8], 1 }
 0x2fd   :  { %1424 = vsyncpa [#allocation8 + $0x1], 1 }
 0x2fe   :  { %1425 = vsyncpa [#allocation11], 1 }
 0x2ff   :  { %1426 = vsyncpa [#allocation6], 1 }
 0x300   :  { %1428 = vsyncpa [#allocation6 + $0x1], 1 }

</bundles_post_ra>
